<compile_context>
chip_gen: v5e
topology: v5e:2x2
jax: 0.10.0
libtpu: 0.0.40
codegen_flags: <defaults>
</compile_context>

<pallas_src>
import functools

import jax
import jax.numpy as jnp
from jax.experimental import pallas as pl
from jax.experimental.pallas import tpu as pltpu

HIDDEN_SIZE = 256
IN_FEATURES = 42
IN_PAD = 128          # 42 features padded up to one lane-width
OUT_PAD = 128         # 1 output padded up to one lane-width (lane-dense store)
MAX_TB = 256          # batch tile (fills v6e/v7x 256x256 MXU; fine on v5e too)


def _critic_kernel(x_ref, w1_ref, b1_ref, w2_ref, b2_ref, w3_ref, b3_ref, o_ref):
    # x: (TB, 128) bf16, weights bf16, biases f32, f32 MXU accumulation.
    h1 = jnp.dot(x_ref[...], w1_ref[...], preferred_element_type=jnp.float32) + b1_ref[...]
    h1 = jnp.maximum(h1, 0.0).astype(jnp.bfloat16)
    h2 = jnp.dot(h1, w2_ref[...], preferred_element_type=jnp.float32) + b2_ref[...]
    h2 = jnp.maximum(h2, 0.0).astype(jnp.bfloat16)
    o_ref[...] = jnp.dot(h2, w3_ref[...], preferred_element_type=jnp.float32) + b3_ref[...]


def prepare_params(params):
    """One-time: transpose, zero-pad and downcast weights to TPU-friendly tiles.

    Zero padding is exact: padded input lanes / output lanes contribute 0 to the
    valid output elements.
    """
    w1, b1, w2, b2, w3, b3 = params
    w1_p = (jnp.zeros((IN_PAD, HIDDEN_SIZE), jnp.float32)
            .at[:IN_FEATURES, :].set(w1.T)).astype(jnp.bfloat16)        # (128, 256)
    b1_p = jnp.reshape(b1, (1, HIDDEN_SIZE)).astype(jnp.float32)        # (1, 256)
    w2_p = w2.T.astype(jnp.bfloat16)                                    # (256, 256)
    b2_p = jnp.reshape(b2, (1, HIDDEN_SIZE)).astype(jnp.float32)        # (1, 256)
    w3_p = (jnp.zeros((HIDDEN_SIZE, OUT_PAD), jnp.float32)
            .at[:, :1].set(w3.T)).astype(jnp.bfloat16)                  # (256, 128)
    b3_p = jnp.zeros((1, OUT_PAD), jnp.float32).at[0, 0].set(b3[0])     # (1, 128)
    return (w1_p, b1_p, w2_p, b2_p, w3_p, b3_p)


def _pallas_critic(b_pad, tb):
    """Build the pallas_call for a (b_pad, IN_PAD) bf16 input tiled by tb rows."""
    per_layer = IN_PAD * HIDDEN_SIZE + HIDDEN_SIZE * HIDDEN_SIZE + HIDDEN_SIZE * OUT_PAD
    cost = pl.CostEstimate(
        flops=2 * b_pad * per_layer,
        transcendentals=0,
        bytes_accessed=(2 * per_layer                       # bf16 weights
                        + 4 * (2 * HIDDEN_SIZE + OUT_PAD)   # f32 biases
                        + 2 * b_pad * IN_PAD                # bf16 input
                        + 4 * b_pad * OUT_PAD),             # f32 output
    )
    return pl.pallas_call(
        _critic_kernel,
        out_shape=jax.ShapeDtypeStruct((b_pad, OUT_PAD), jnp.float32),
        grid=(b_pad // tb,),
        in_specs=[
            pl.BlockSpec((tb, IN_PAD), lambda i: (i, 0)),
            # Weights/biases: constant index_map -> stay VMEM-resident across
            # all grid steps (no re-DMA of the ~0.26 MiB of bf16 weights).
            pl.BlockSpec((IN_PAD, HIDDEN_SIZE), lambda i: (0, 0)),
            pl.BlockSpec((1, HIDDEN_SIZE), lambda i: (0, 0)),
            pl.BlockSpec((HIDDEN_SIZE, HIDDEN_SIZE), lambda i: (0, 0)),
            pl.BlockSpec((1, HIDDEN_SIZE), lambda i: (0, 0)),
            pl.BlockSpec((HIDDEN_SIZE, OUT_PAD), lambda i: (0, 0)),
            pl.BlockSpec((1, OUT_PAD), lambda i: (0, 0)),
        ],
        out_specs=pl.BlockSpec((tb, OUT_PAD), lambda i: (i, 0)),
        compiler_params=pltpu.CompilerParams(
            dimension_semantics=("parallel",),
            vmem_limit_bytes=32 << 20,
        ),
        cost_estimate=cost,
    )


@jax.jit
def critic_forward_batched(x_rows, prepared):
    """x_rows: (B, 42) float. Returns (B, 1) float32 critic values."""
    b = x_rows.shape[0]
    b_pad = max(8, -(-b // 8) * 8)
    if b_pad > MAX_TB:
        tb = MAX_TB
        b_pad = -(-b_pad // tb) * tb
    else:
        tb = b_pad
    x_tile = (jnp.zeros((b_pad, IN_PAD), jnp.bfloat16)
              .at[:b, :IN_FEATURES].set(x_rows.astype(jnp.bfloat16)))
    out_tile = _pallas_critic(b_pad, tb)(x_tile, *prepared)
    return out_tile[:b, :1]


def critic_forward(x, prepared):
    """Matches CriticNetwork.forward exactly: flattens the WHOLE input (42 elems)
    into a single vector and returns shape (1,)."""
    x_row = jnp.reshape(x, (1, IN_FEATURES)).astype(jnp.float32)
    return critic_forward_batched(x_row, prepared)[0]


def init_params(key):
    """Deterministic init mimicking nn.Linear defaults: U(-1/sqrt(fan_in), +...)."""
    def linear(key, fan_in, fan_out):
        kw, kb = jax.random.split(key)
        bound = 1.0 / jnp.sqrt(fan_in)
        w = jax.random.uniform(kw, (fan_out, fan_in), jnp.float32, -bound, bound)
        b = jax.random.uniform(kb, (fan_out,), jnp.float32, -bound, bound)
        return w, b

    k1, k2, k3 = jax.random.split(key, 3)
    w1, b1 = linear(k1, IN_FEATURES, HIDDEN_SIZE)
    w2, b2 = linear(k2, HIDDEN_SIZE, HIDDEN_SIZE)
    w3, b3 = linear(k3, HIDDEN_SIZE, 1)
    return (w1, b1, w2, b2, w3, b3)


def critic_reference_f32(x, params):
    """Pure-JAX f32 reference mirroring the PyTorch forward exactly."""
    w1, b1, w2, b2, w3, b3 = params
    v = jnp.reshape(x, (-1,)).astype(jnp.float32)     # Flatten(start_dim=0)
    v = jnp.maximum(v @ w1.T + b1, 0.0)
    v = jnp.maximum(v @ w2.T + b2, 0.0)
    return v @ w3.T + b3                              # shape (1,)


def critic_reference_bf16(x_rows, prepared):
    """Reference that mirrors the kernel numerics (bf16 weights/acts, f32 acc)."""
    w1_p, b1_p, w2_p, b2_p, w3_p, b3_p = prepared
    b = x_rows.shape[0]
    xb = (jnp.zeros((b, IN_PAD), jnp.bfloat16)
          .at[:, :IN_FEATURES].set(x_rows.astype(jnp.bfloat16)))
    h1 = jnp.maximum(jnp.dot(xb, w1_p, preferred_element_type=jnp.float32) + b1_p, 0.0)
    h1 = h1.astype(jnp.bfloat16)
    h2 = jnp.maximum(jnp.dot(h1, w2_p, preferred_element_type=jnp.float32) + b2_p, 0.0)
    h2 = h2.astype(jnp.bfloat16)
    return (jnp.dot(h2, w3_p, preferred_element_type=jnp.float32) + b3_p)[:, :1]


if __name__ == "__main__":
    key = jax.random.PRNGKey(0)
    kp, kx, kb = jax.random.split(key, 3)
    params = init_params(kp)
    prepared = prepare_params(params)           # one-time weight prep (hoisted)

    # --- single example, module-exact semantics (Connect-4 board: 6x7 = 42) ---
    x = jax.random.normal(kx, (6, 7), dtype=jnp.float32)
    out = jax.block_until_ready(critic_forward(x, prepared))
    ref_bf16 = jax.block_until_ready(
        critic_reference_bf16(jnp.reshape(x, (1, -1)), prepared))[0]
    ref_f32 = jax.block_until_ready(critic_reference_f32(x, params))

    assert out.shape == (1,), out.shape
    # tight check vs. a reference with identical (bf16) numerics
    assert jnp.allclose(out, ref_bf16, atol=1e-2, rtol=1e-2), (out, ref_bf16)
    # loose sanity check vs. the pure-f32 PyTorch-equivalent reference
    assert jnp.allclose(out, ref_f32, atol=5e-2, rtol=5e-2), (out, ref_f32)

    # --- small batched throughput path: 16 boards -> (16, 1) ---
    xb = jax.random.normal(kb, (16, 6, 7), dtype=jnp.float32)
    xb_rows = jnp.reshape(xb, (16, -1))
    outs = jax.block_until_ready(critic_forward_batched(xb_rows, prepared))
    refs = jax.block_until_ready(critic_reference_bf16(xb_rows, prepared))
    assert outs.shape == (16, 1), outs.shape
    assert jnp.allclose(outs, refs, atol=1e-2, rtol=1e-2), (outs, refs)

    print("KERNEL_OK")
</pallas_src>

<mosaic_0001>
module attributes {stable_mosaic.version = 11 : i64} {
  func.func @_critic_kernel(%arg0: i32, %arg1: memref<8x128xbf16, #tpu.memory_space<vmem>>, %arg2: memref<128x256xbf16, #tpu.memory_space<vmem>>, %arg3: memref<1x256xf32, #tpu.memory_space<vmem>>, %arg4: memref<256x256xbf16, #tpu.memory_space<vmem>>, %arg5: memref<1x256xf32, #tpu.memory_space<vmem>>, %arg6: memref<256x128xbf16, #tpu.memory_space<vmem>>, %arg7: memref<1x128xf32, #tpu.memory_space<vmem>>, %arg8: memref<8x128xf32, #tpu.memory_space<vmem>>) attributes {dimension_semantics = [#tpu.dimension_semantics<parallel>], iteration_bounds = array<i64: 1>, scalar_prefetch = 0 : i64, scratch_operands = 0 : i64, tpu.core_type = #tpu.core_type<tc>, window_params = [{transform_indices = @transform_0, window_bounds = array<i64: 8, 128>}, {pipeline_mode = #tpu.pipeline_mode<synchronous>, transform_indices = @transform_1, window_bounds = array<i64: 128, 256>}, {pipeline_mode = #tpu.pipeline_mode<synchronous>, transform_indices = @transform_2, window_bounds = array<i64: 1, 256>}, {pipeline_mode = #tpu.pipeline_mode<synchronous>, transform_indices = @transform_3, window_bounds = array<i64: 256, 256>}, {pipeline_mode = #tpu.pipeline_mode<synchronous>, transform_indices = @transform_4, window_bounds = array<i64: 1, 256>}, {pipeline_mode = #tpu.pipeline_mode<synchronous>, transform_indices = @transform_5, window_bounds = array<i64: 256, 128>}, {pipeline_mode = #tpu.pipeline_mode<synchronous>, transform_indices = @transform_6, window_bounds = array<i64: 1, 128>}, {transform_indices = @transform_7, window_bounds = array<i64: 8, 128>}]} {
    %c0 = arith.constant 0 : index
    %c0_0 = arith.constant 0 : index
    %0 = vector.load %arg1[%c0, %c0_0] : memref<8x128xbf16, #tpu.memory_space<vmem>>, vector<8x128xbf16>
    %c0_1 = arith.constant 0 : index
    %c0_2 = arith.constant 0 : index
    %1 = vector.load %arg2[%c0_1, %c0_2] : memref<128x256xbf16, #tpu.memory_space<vmem>>, vector<128x256xbf16>
    %cst = arith.constant dense<0.000000e+00> : vector<8x256xf32>
    %2 = tpu.matmul %0, %1, %cst {dimension_numbers = #tpu.dot_dimension_numbers<[1], [0], [0], [1], [0, 0, 1, 1], [], []>} : vector<8x128xbf16>, vector<128x256xbf16>, vector<8x256xf32> -> vector<8x256xf32>
    %c0_3 = arith.constant 0 : index
    %c0_4 = arith.constant 0 : index
    %3 = vector.load %arg3[%c0_3, %c0_4] : memref<1x256xf32, #tpu.memory_space<vmem>>, vector<1x256xf32>
    %4 = vector.broadcast %3 : vector<1x256xf32> to vector<8x256xf32>
    %5 = arith.addf %2, %4 : vector<8x256xf32>
    %cst_5 = arith.constant 0.000000e+00 : f32
    %6 = vector.broadcast %cst_5 : f32 to vector<8x256xf32>
    %7 = arith.maximumf %5, %6 : vector<8x256xf32>
    %8 = arith.truncf %7 : vector<8x256xf32> to vector<8x256xbf16>
    %c0_6 = arith.constant 0 : index
    %c0_7 = arith.constant 0 : index
    %9 = vector.load %arg4[%c0_6, %c0_7] : memref<256x256xbf16, #tpu.memory_space<vmem>>, vector<256x256xbf16>
    %cst_8 = arith.constant dense<0.000000e+00> : vector<8x256xf32>
    %10 = tpu.matmul %8, %9, %cst_8 {dimension_numbers = #tpu.dot_dimension_numbers<[1], [0], [0], [1], [0, 0, 1, 1], [], []>} : vector<8x256xbf16>, vector<256x256xbf16>, vector<8x256xf32> -> vector<8x256xf32>
    %c0_9 = arith.constant 0 : index
    %c0_10 = arith.constant 0 : index
    %11 = vector.load %arg5[%c0_9, %c0_10] : memref<1x256xf32, #tpu.memory_space<vmem>>, vector<1x256xf32>
    %12 = vector.broadcast %11 : vector<1x256xf32> to vector<8x256xf32>
    %13 = arith.addf %10, %12 : vector<8x256xf32>
    %cst_11 = arith.constant 0.000000e+00 : f32
    %14 = vector.broadcast %cst_11 : f32 to vector<8x256xf32>
    %15 = arith.maximumf %13, %14 : vector<8x256xf32>
    %16 = arith.truncf %15 : vector<8x256xf32> to vector<8x256xbf16>
    %c0_12 = arith.constant 0 : index
    %c0_13 = arith.constant 0 : index
    %17 = vector.load %arg6[%c0_12, %c0_13] : memref<256x128xbf16, #tpu.memory_space<vmem>>, vector<256x128xbf16>
    %cst_14 = arith.constant dense<0.000000e+00> : vector<8x128xf32>
    %18 = tpu.matmul %16, %17, %cst_14 {dimension_numbers = #tpu.dot_dimension_numbers<[1], [0], [0], [1], [0, 0, 1, 1], [], []>} : vector<8x256xbf16>, vector<256x128xbf16>, vector<8x128xf32> -> vector<8x128xf32>
    %c0_15 = arith.constant 0 : index
    %c0_16 = arith.constant 0 : index
    %19 = vector.load %arg7[%c0_15, %c0_16] : memref<1x128xf32, #tpu.memory_space<vmem>>, vector<1x128xf32>
    %20 = vector.broadcast %19 : vector<1x128xf32> to vector<8x128xf32>
    %21 = arith.addf %18, %20 : vector<8x128xf32>
    %c0_17 = arith.constant 0 : index
    %c0_18 = arith.constant 0 : index
    %22 = vector.load %arg8[%c0_17, %c0_18] : memref<8x128xf32, #tpu.memory_space<vmem>>, vector<8x128xf32>
    tpu.vector_store %arg8[%c0_17, %c0_18], %21 {strides = array<i32>} : memref<8x128xf32, #tpu.memory_space<vmem>>, vector<8x128xf32>,
    return
  }
  func.func @transform_0(%arg0: i32) -> (i32, i32) {
    %c0_i32 = arith.constant 0 : i32
    %c0_i32_0 = arith.constant 0 : i32
    return %arg0, %c0_i32 : i32, i32
  }
  func.func @transform_1(%arg0: i32) -> (i32, i32) {
    %c0_i32 = arith.constant 0 : i32
    %c0_i32_0 = arith.constant 0 : i32
    %c0_i32_1 = arith.constant 0 : i32
    return %c0_i32, %c0_i32_0 : i32, i32
  }
  func.func @transform_2(%arg0: i32) -> (i32, i32) {
    %c0_i32 = arith.constant 0 : i32
    %c0_i32_0 = arith.constant 0 : i32
    %c0_i32_1 = arith.constant 0 : i32
    return %c0_i32, %c0_i32_0 : i32, i32
  }
  func.func @transform_3(%arg0: i32) -> (i32, i32) {
    %c0_i32 = arith.constant 0 : i32
    %c0_i32_0 = arith.constant 0 : i32
    %c0_i32_1 = arith.constant 0 : i32
    return %c0_i32, %c0_i32_0 : i32, i32
  }
  func.func @transform_4(%arg0: i32) -> (i32, i32) {
    %c0_i32 = arith.constant 0 : i32
    %c0_i32_0 = arith.constant 0 : i32
    %c0_i32_1 = arith.constant 0 : i32
    return %c0_i32, %c0_i32_0 : i32, i32
  }
  func.func @transform_5(%arg0: i32) -> (i32, i32) {
    %c0_i32 = arith.constant 0 : i32
    %c0_i32_0 = arith.constant 0 : i32
    %c0_i32_1 = arith.constant 0 : i32
    return %c0_i32, %c0_i32_0 : i32, i32
  }
  func.func @transform_6(%arg0: i32) -> (i32, i32) {
    %c0_i32 = arith.constant 0 : i32
    %c0_i32_0 = arith.constant 0 : i32
    %c0_i32_1 = arith.constant 0 : i32
    return %c0_i32, %c0_i32_0 : i32, i32
  }
  func.func @transform_7(%arg0: i32) -> (i32, i32) {
    %c0_i32 = arith.constant 0 : i32
    %c0_i32_0 = arith.constant 0 : i32
    return %arg0, %c0_i32 : i32, i32
  }
}

</mosaic_0001>

<bundles_post_ra>
// kernel: critic_forward_batched.1
= control target key start
LH: loop header
LB: loop body
LE: loop exit
PB: predicated region body
PF: predicated region fallthrough
CT: control target
= control target key end

     0   :  { %12 = vsyncpa [#allocation3], 0  ;;  %s1100_s0 = inlined_call_operand.vmem [shape: bf16[8,128], index: 0, kind: input, shape index: {}]   ;;  %s1101_s1 = inlined_call_operand.hbm [shape: bf16[128,256], index: 1, kind: input, shape index: {}]   ;;  %s1102_s2 = inlined_call_operand.vmem [shape: f32[1,256], index: 2, kind: input, shape index: {}]   ;;  %s1103_s3 = inlined_call_operand.hbm [shape: bf16[256,256], index: 3, kind: input, shape index: {}]   ;;  %s1104_s4 = inlined_call_operand.vmem [shape: f32[1,256], index: 4, kind: input, shape index: {}]   ;;  %s1105_s5 = inlined_call_operand.hbm [shape: bf16[256,128], index: 5, kind: input, shape index: {}]   ;;  %s1106_s6 = inlined_call_operand.vmem [shape: f32[1,128], index: 6, kind: input, shape index: {}]   ;;  %s1107_s7 = inlined_call_operand.vmem [shape: f32[8,128], index: 7, kind: output, shape index: {}]  }
   0x1   :  { %13 = vsyncpa [#allocation5], 0  ;;  %s35_s26 = sshll.u32 %s1103_s3, 4  ;;  %s1029_s27 = smov [#allocation4]   ;;  %s36_s26 = int_to_ptr.hbm [resolvable:$true] %s35_s26 }
   0x2   :  { %s37_s28 = sshll.u32 %s1029_s27, 4  ;;  %s20_s8 = sshll.u32 %s1101_s1, 4  ;;  %s38_s28 = int_to_ptr.vmem [resolvable:$true] %s37_s28  ;;  %s21_s8 = int_to_ptr.hbm [resolvable:$true] %s20_s8 }
   0x3   :  { %s1030_s9 = smov 128   ;;  %s1031_s10 = smov 8  }
   0x4   :  { %43 = dma.hbm_to_vmem [thread:$0]  %s36_s26, 4096, %s38_s28, [#allocation5], %s1030_s9, %s1030_s9, %s1031_s10  }
   0x5   :  { %s1032_s11 = smov [#allocation2]   ;;  %s50_s15 = sshll.u32 %s1105_s5, 4  ;;  %s51_s15 = int_to_ptr.hbm [resolvable:$true] %s50_s15 }
   0x6   :  { %s22_s12 = sshll.u32 %s1032_s11, 4  ;;  %s1033_s3 = smov [#allocation6]   ;;  %s23_s12 = int_to_ptr.vmem [resolvable:$true] %s22_s12 }
   0x7   :  { %28 = dma.hbm_to_vmem [thread:$0]  %s21_s8, 2048, %s23_s12, [#allocation3], %s1030_s9, %s1030_s9, %s1031_s10  }
   0x8   :  { %s52_s16 = sshll.u32 %s1033_s3, 4  ;;  %s1034_s17 = smov 64   ;;  %s53_s16 = int_to_ptr.vmem [resolvable:$true] %s52_s16 }
   0x9   :  { %s1035_s18 = smov 4  }
   0xa   :  { %58 = dma.hbm_to_vmem [thread:$0]  %s51_s15, 2048, %s53_s16, [#allocation5], %s1034_s17, %s1034_s17, %s1035_s18  }
   0xb   :  { %1025 = dma.done.wait [#allocation3], 2048  }
   0xc   :  { %1026 = vsyncadd [#allocation3], 4294965248 }
   0xd   :  { %1027 = dma.done.wait [#allocation5], 6144  }
   0xe   :  { %1028 = vsyncadd [#allocation5], 4294961152  ;;  %v683_v0 = vld [vmem:[#allocation2 + $0x70] sm:$0xf]  ;;  %v896_v1 = vld [vmem:[#allocation2 + $0x74] sm:$0xf0] }
   0xf   :  { %v895_v2 = vld [vmem:[#allocation2 + $0x74] sm:$0xf]  ;;  %v684_v3 = vor.u32 %v896_v1, %v683_v0  ;;  %v685_v4 = vld [vmem:[#allocation2 + $0x78] sm:$0xf0]  ;;  %v675_v5 = vld [vmem:[#allocation2 + $0x60] sm:$0xf] }
  0x10   :  { %v894_v6 = vld [vmem:[#allocation2 + $0x64] sm:$0xf0]  ;;  %v688_v7 = vor.u32 %v895_v2, %v685_v4  ;;  %v893_v8 = vld [vmem:[#allocation2 + $0x64] sm:$0xf]  ;;  %v677_v9 = vld [vmem:[#allocation2 + $0x68] sm:$0xf0] }
  0x11   :  { %176 = vmatpush.bf16.msra.mxu0 %v684_v3  ;;  %v676_v10 = vor.u32 %v894_v6, %v675_v5  ;;  %v680_v11 = vor.u32 %v893_v8, %v677_v9  ;;  %v667_v12 = vld [vmem:[#allocation2 + $0x50] sm:$0xf]  ;;  %v892_v13 = vld [vmem:[#allocation2 + $0x54] sm:$0xf0]  ;;  %v891_v14 = vld [vmem:[#allocation2 + $0x54] sm:$0xf] }
  0x12   :  { %189 = vmatpush.bf16.msra.mxu1 %v688_v7  ;;  %v669_v15 = vld [vmem:[#allocation2 + $0x58] sm:$0xf0]  ;;  %v668_v16 = vor.u32 %v892_v13, %v667_v12  ;;  %v659_v18 = vld [vmem:[#allocation2 + $0x40] sm:$0xf]  ;;  %v890_v19 = vld [vmem:[#allocation2 + $0x44] sm:$0xf0] }
  0x13   :  { %v672_v17 = vor.u32 %v891_v14, %v669_v15  ;;  %v889_v20 = vld [vmem:[#allocation2 + $0x44] sm:$0xf]  ;;  %v661_v21 = vld [vmem:[#allocation2 + $0x48] sm:$0xf0]  ;;  %v660_v22 = vor.u32 %v890_v19, %v659_v18  ;;  %v747_v23 = vld [vmem:[#allocation4 + $0x70] sm:$0xf] }
  0x14   :  { %v912_v24 = vld [vmem:[#allocation4 + $0x74] sm:$0xf0]  ;;  %v811_v25 = vld [vmem:[#allocation4 + $0xf0] sm:$0xf]  ;;  %v664_v26 = vor.u32 %v889_v20, %v661_v21  ;;  %v887_v31 = vld [vmem:[#allocation2 + $0x34] sm:$0xf] }
  0x15   :  { %177 = vmatpush.bf16.msra.mxu0 %v676_v10  ;;  %v651_v27 = vld [vmem:[#allocation2 + $0x30] sm:$0xf]  ;;  %v888_v28 = vld [vmem:[#allocation2 + $0x34] sm:$0xf0]  ;;  %v748_v29 = vor.u32 %v912_v24, %v747_v23  ;;  %v653_v32 = vld [vmem:[#allocation2 + $0x38] sm:$0xf0] }
  0x16   :  { %190 = vmatpush.bf16.msra.mxu1 %v680_v11  ;;  %v928_v30 = vld [vmem:[#allocation4 + $0xf4] sm:$0xf0]  ;;  %v739_v34 = vld [vmem:[#allocation4 + $0x60] sm:$0xf]  ;;  %v910_v35 = vld [vmem:[#allocation4 + $0x64] sm:$0xf0]  ;;  %v652_v38 = vor.u32 %v888_v28, %v651_v27  ;;  %v656_v43 = vor.u32 %v887_v31, %v653_v32 }
  0x17   :  { %v812_v33 = vor.u32 %v928_v30, %v811_v25  ;;  %404 = vmatpush.bf16.msra.mxu2 %v748_v29  ;;  %v803_v36 = vld [vmem:[#allocation4 + $0xe0] sm:$0xf]  ;;  %v926_v37 = vld [vmem:[#allocation4 + $0xe4] sm:$0xf0]  ;;  %v740_v41 = vor.u32 %v910_v35, %v739_v34  ;;  %v885_v44 = vld [vmem:[#allocation2 + $0x24] sm:$0xf] }
  0x18   :  { %v643_v39 = vld [vmem:[#allocation2 + $0x20] sm:$0xf]  ;;  %v886_v40 = vld [vmem:[#allocation2 + $0x24] sm:$0xf0]  ;;  %v804_v42 = vor.u32 %v926_v37, %v803_v36  ;;  %v731_v45 = vld [vmem:[#allocation4 + $0x50] sm:$0xf] }
  0x19   :  { %178 = vmatpush.bf16.msra.mxu0 %v668_v16  ;;  %417 = vmatpush.bf16.msra.mxu3 %v812_v33  ;;  %v908_v46 = vld [vmem:[#allocation4 + $0x54] sm:$0xf0]  ;;  %v645_v47 = vld [vmem:[#allocation2 + $0x28] sm:$0xf0]  ;;  %v795_v48 = vld [vmem:[#allocation4 + $0xd0] sm:$0xf]  ;;  %v644_v51 = vor.u32 %v886_v40, %v643_v39 }
  0x1a   :  { %191 = vmatpush.bf16.msra.mxu1 %v672_v17  ;;  %v924_v49 = vld [vmem:[#allocation4 + $0xd4] sm:$0xf0]  ;;  %v732_v50 = vor.u32 %v908_v46, %v731_v45  ;;  %v635_v52 = vld [vmem:[#allocation2 + $0x10] sm:$0xf]  ;;  %v723_v54 = vld [vmem:[#allocation4 + $0x40] sm:$0xf]  ;;  %v648_v56 = vor.u32 %v885_v44, %v645_v47 }
  0x1b   :  { %405 = vmatpush.bf16.msra.mxu2 %v740_v41  ;;  %v796_v53 = vor.u32 %v924_v49, %v795_v48  ;;  %v906_v55 = vld [vmem:[#allocation4 + $0x44] sm:$0xf0]  ;;  %v884_v57 = vld [vmem:[#allocation2 + $0x14] sm:$0xf0]  ;;  %v787_v58 = vld [vmem:[#allocation4 + $0xc0] sm:$0xf] }
  0x1c   :  { %v922_v59 = vld [vmem:[#allocation4 + $0xc4] sm:$0xf0]  ;;  %v883_v60 = vld [vmem:[#allocation2 + $0x14] sm:$0xf]  ;;  %v637_v61 = vld [vmem:[#allocation2 + $0x18] sm:$0xf0]  ;;  %v724_v63 = vor.u32 %v906_v55, %v723_v54  ;;  %v636_v0 = vor.u32 %v884_v57, %v635_v52 }
  0x1d   :  { %179 = vmatpush.bf16.msra.mxu0 %v660_v22  ;;  %418 = vmatpush.bf16.msra.mxu3 %v804_v42  ;;  %v627_v62 = vld [vmem:[#allocation2] sm:$0xf]  ;;  %v882_v1 = vld [vmem:[#allocation2 + $0x4] sm:$0xf0]  ;;  %v788_v2 = vor.u32 %v922_v59, %v787_v58  ;;  %v715_v3 = vld [vmem:[#allocation4 + $0x30] sm:$0xf]  ;;  %v640_v5 = vor.u32 %v883_v60, %v637_v61 }
  0x1e   :  { %192 = vmatpush.bf16.msra.mxu1 %v664_v26  ;;  %v904_v4 = vld [vmem:[#allocation4 + $0x34] sm:$0xf0]  ;;  %v881_v6 = vld [vmem:[#allocation2 + $0x4] sm:$0xf]  ;;  %v779_v7 = vld [vmem:[#allocation4 + $0xb0] sm:$0xf]  ;;  %v628_v15 = vor.u32 %v882_v1, %v627_v62 }
  0x1f   :  { %406 = vmatpush.bf16.msra.mxu2 %v732_v50  ;;  %v920_v8 = vld [vmem:[#allocation4 + $0xb4] sm:$0xf0]  ;;  %v629_v9 = vld [vmem:[#allocation2 + $0x8] sm:$0xf0]  ;;  %v911_v10 = vld [vmem:[#allocation4 + $0x74] sm:$0xf]  ;;  %v716_v14 = vor.u32 %v904_v4, %v715_v3 }
  0x20   :  { %v749_v11 = vld [vmem:[#allocation4 + $0x78] sm:$0xf0]  ;;  %v927_v12 = vld [vmem:[#allocation4 + $0xf4] sm:$0xf]  ;;  %v780_v16 = vor.u32 %v920_v8, %v779_v7  ;;  %v707_v17 = vld [vmem:[#allocation4 + $0x20] sm:$0xf]  ;;  %v632_v19 = vor.u32 %v881_v6, %v629_v9 }
  0x21   :  { %180 = vmatpush.bf16.msra.mxu0 %v652_v38  ;;  %419 = vmatpush.bf16.msra.mxu3 %v796_v53  ;;  %v813_v13 = vld [vmem:[#allocation4 + $0xf8] sm:$0xf0]  ;;  %v902_v18 = vld [vmem:[#allocation4 + $0x24] sm:$0xf0]  ;;  %v752_v20 = vor.u32 %v911_v10, %v749_v11  ;;  %v771_v21 = vld [vmem:[#allocation4 + $0xa0] sm:$0xf] }
  0x22   :  { %193 = vmatpush.bf16.msra.mxu1 %v656_v43  ;;  %v918_v22 = vld [vmem:[#allocation4 + $0xa4] sm:$0xf0]  ;;  %v816_v23 = vor.u32 %v927_v12, %v813_v13  ;;  %v909_v24 = vld [vmem:[#allocation4 + $0x64] sm:$0xf]  ;;  %v741_v25 = vld [vmem:[#allocation4 + $0x68] sm:$0xf0]  ;;  %v708_v28 = vor.u32 %v902_v18, %v707_v17 }
  0x23   :  { %407 = vmatpush.bf16.msra.mxu2 %v724_v63  ;;  %v925_v26 = vld [vmem:[#allocation4 + $0xe4] sm:$0xf]  ;;  %v805_v27 = vld [vmem:[#allocation4 + $0xe8] sm:$0xf0]  ;;  %v73_v29 = vld [vmem:[%s1100_s0] sm:$0xf]  ;;  %v772_v30 = vor.u32 %v918_v22, %v771_v21  ;;  %v744_v31 = vor.u32 %v909_v24, %v741_v25 }
  0x24   :  { %v808_v32 = vor.u32 %v925_v26, %v805_v27  ;;  %v907_v33 = vld [vmem:[#allocation4 + $0x54] sm:$0xf]  ;;  %v733_v34 = vld [vmem:[#allocation4 + $0x58] sm:$0xf0]  ;;  %v905_v39 = vld [vmem:[#allocation4 + $0x44] sm:$0xf] }
  0x25   :  { %181 = vmatpush.bf16.msra.mxu0 %v644_v51  ;;  %420 = vmatpush.bf16.msra.mxu3 %v788_v2  ;;  %v923_v35 = vld [vmem:[#allocation4 + $0xd4] sm:$0xf]  ;;  %v797_v36 = vld [vmem:[#allocation4 + $0xd8] sm:$0xf0]  ;;  %v736_v37 = vor.u32 %v907_v33, %v733_v34  ;;  %v725_v40 = vld [vmem:[#allocation4 + $0x48] sm:$0xf0] }
  0x26   :  { %194 = vmatpush.bf16.msra.mxu1 %v648_v56  ;;  %v800_v38 = vor.u32 %v923_v35, %v797_v36  ;;  %v921_v41 = vld [vmem:[#allocation4 + $0xc4] sm:$0xf]  ;;  %v789_v42 = vld [vmem:[#allocation4 + $0xc8] sm:$0xf0]  ;;  %v728_v43 = vor.u32 %v905_v39, %v725_v40  ;;  %v903_v45 = vld [vmem:[#allocation4 + $0x34] sm:$0xf] }
  0x27   :  { %408 = vmatpush.bf16.msra.mxu2 %v716_v14  ;;  %v792_v44 = vor.u32 %v921_v41, %v789_v42  ;;  %v717_v46 = vld [vmem:[#allocation4 + $0x38] sm:$0xf0]  ;;  %v919_v47 = vld [vmem:[#allocation4 + $0xb4] sm:$0xf]  ;;  %v901_v51 = vld [vmem:[#allocation4 + $0x24] sm:$0xf] }
  0x28   :  { %v781_v48 = vld [vmem:[#allocation4 + $0xb8] sm:$0xf0]  ;;  %v720_v49 = vor.u32 %v903_v45, %v717_v46  ;;  %v709_v52 = vld [vmem:[#allocation4 + $0x28] sm:$0xf0]  ;;  %v917_v53 = vld [vmem:[#allocation4 + $0xa4] sm:$0xf] }
  0x29   :  { %182 = vmatpush.bf16.msra.mxu0 %v636_v0  ;;  %421 = vmatpush.bf16.msra.mxu3 %v780_v16  ;;  %v784_v50 = vor.u32 %v919_v47, %v781_v48  ;;  %v773_v54 = vld [vmem:[#allocation4 + $0xa8] sm:$0xf0]  ;;  %v712_v55 = vor.u32 %v901_v51, %v709_v52  ;;  %v699_v57 = vld [vmem:[#allocation4 + $0x10] sm:$0xf]  ;;  %v900_v58 = vld [vmem:[#allocation4 + $0x14] sm:$0xf0] }
  0x2a   :  { %195 = vmatpush.bf16.msra.mxu1 %v640_v5  ;;  %v776_v56 = vor.u32 %v917_v53, %v773_v54  ;;  %v763_v59 = vld [vmem:[#allocation4 + $0x90] sm:$0xf]  ;;  %v700_v60 = vor.u32 %v900_v58, %v699_v57  ;;  %v916_v61 = vld [vmem:[#allocation4 + $0x94] sm:$0xf0]  ;;  %v899_v62 = vld [vmem:[#allocation4 + $0x14] sm:$0xf] }
  0x2b   :  { %409 = vmatpush.bf16.msra.mxu2 %v708_v28  ;;  %v701_v63 = vld [vmem:[#allocation4 + $0x18] sm:$0xf0]  ;;  %v764_v0 = vor.u32 %v916_v61, %v763_v59  ;;  %v915_v2 = vld [vmem:[#allocation4 + $0x94] sm:$0xf]  ;;  %v691_v5 = vld [vmem:[#allocation4] sm:$0xf] }
  0x2c   :  { %v704_v1 = vor.u32 %v899_v62, %v701_v63  ;;  %v765_v3 = vld [vmem:[#allocation4 + $0x98] sm:$0xf0]  ;;  %v898_v6 = vld [vmem:[#allocation4 + $0x4] sm:$0xf0]  ;;  %v755_v7 = vld [vmem:[#allocation4 + $0x80] sm:$0xf] }
  0x2d   :  { %183 = vmatpush.bf16.msra.mxu0 %v628_v15  ;;  %422 = vmatpush.bf16.msra.mxu3 %v772_v30  ;;  %v768_v4 = vor.u32 %v915_v2, %v765_v3  ;;  %v692_v8 = vor.u32 %v898_v6, %v691_v5  ;;  %v914_v9 = vld [vmem:[#allocation4 + $0x84] sm:$0xf0]  ;;  %v897_v10 = vld [vmem:[#allocation4 + $0x4] sm:$0xf]  ;;  %v693_v11 = vld [vmem:[#allocation4 + $0x8] sm:$0xf0] }
  0x2e   :  { %196 = vmatpush.bf16.msra.mxu1 %v632_v19  ;;  %v756_v12 = vor.u32 %v914_v9, %v755_v7  ;;  %v696_v13 = vor.u32 %v897_v10, %v693_v11  ;;  %v913_v14 = vld [vmem:[#allocation4 + $0x84] sm:$0xf]  ;;  %v757_v15 = vld [vmem:[#allocation4 + $0x88] sm:$0xf0]  ;;  %v944_v17 = vld [vmem:[#allocation6 + $0x78] sm:$0xff] }
  0x2f   :  { %410 = vmatpush.bf16.msra.mxu2 %v700_v60  ;;  %v760_v16 = vor.u32 %v913_v14, %v757_v15  ;;  %v936_v18 = vld [vmem:[#allocation6 + $0x38] sm:$0xff]  ;;  %v943_v19 = vld [vmem:[#allocation6 + $0x70] sm:$0xff]  ;;  %v942_v21 = vld [vmem:[#allocation6 + $0x68] sm:$0xff] }
  0x30   :  { %184 = vmatmul.bf16.vlgmr.msra.gmra.mxu0 %v73_v29  ;;  %v934_v22 = vld [vmem:[#allocation6 + $0x28] sm:$0xff]  ;;  %v933_v24 = vld [vmem:[#allocation6 + $0x20] sm:$0xff]  ;;  %v940_v25 = vld [vmem:[#allocation6 + $0x58] sm:$0xff] }
  0x31   :  { %430 = vmatpush.bf16.msrb.mxu0 %v752_v20  ;;  %197 = vmatmul.bf16.vlgmr.msra.gmra.mxu1 %v73_v29  ;;  %v935_v20 = vld [vmem:[#allocation6 + $0x30] sm:$0xff]  ;;  %v90_v26 = vld [vmem:[%s1102_s2] sm:$0x3]  ;;  %v932_v40 = vld [vmem:[#allocation6 + $0x18] sm:$0xff] }
  0x32   :  { %443 = vmatpush.bf16.msrb.mxu1 %v816_v23  ;;  %423 = vmatpush.bf16.msra.mxu3 %v764_v0  ;;  %v941_v23 = vld [vmem:[#allocation6 + $0x60] sm:$0xff]  ;;  %v939_v27 = vld [vmem:[#allocation6 + $0x50] sm:$0xff]  ;;  %v92_v28 = vperm.slane %v90_v26, 0  ;;  %v93_v29 = vperm.slane %v90_v26, 1  ;;  %v938_v41 = vld [vmem:[#allocation6 + $0x48] sm:$0xff] }
  0x33   :  { %411 = vmatpush.bf16.msra.mxu2 %v692_v8  ;;  %v931_v42 = vld [vmem:[#allocation6 + $0x10] sm:$0xff]  ;;  %v929_v45 = vld [vmem:[#allocation6] sm:$0xff] }
  0x34   :  { %v238_v46 = vld [vmem:[%s1104_s4] sm:$0x3] }
  0x35   :  { %431 = vmatpush.bf16.msrb.mxu0 %v744_v31  ;;  %v241_v47 = vperm.slane %v238_v46, 1  ;;  %v240_v52 = vperm.slane %v238_v46, 0  ;;  %v952_v2 = vld [vmem:[%s1106_s6] ss:$0 sm:$0xff] }
  0x36   :  { %444 = vmatpush.bf16.msrb.mxu1 %v808_v32  ;;  %424 = vmatpush.bf16.msra.mxu3 %v756_v12 }
  0x37   :  { %592 = vmatpush.bf16.msrb.mxu2 %v936_v18 }
  0x39   :  { %432 = vmatpush.bf16.msrb.mxu0 %v736_v37 }
  0x3a   :  { %445 = vmatpush.bf16.msrb.mxu1 %v800_v38  ;;  %605 = vmatpush.bf16.msrb.mxu3 %v944_v17 }
  0x3b   :  { %593 = vmatpush.bf16.msrb.mxu2 %v935_v20 }
  0x3d   :  { %433 = vmatpush.bf16.msrb.mxu0 %v728_v43  ;;  %v937_v43 = vld [vmem:[#allocation6 + $0x40] sm:$0xff] }
  0x3e   :  { %446 = vmatpush.bf16.msrb.mxu1 %v792_v44  ;;  %606 = vmatpush.bf16.msrb.mxu3 %v943_v19  ;;  %v930_v44 = vld [vmem:[#allocation6 + $0x8] sm:$0xff] }
  0x3f   :  { %594 = vmatpush.bf16.msrb.mxu2 %v934_v22 }
  0x41   :  { %434 = vmatpush.bf16.msrb.mxu0 %v720_v49 }
  0x42   :  { %447 = vmatpush.bf16.msrb.mxu1 %v784_v50  ;;  %607 = vmatpush.bf16.msrb.mxu3 %v942_v21 }
  0x43   :  { %595 = vmatpush.bf16.msrb.mxu2 %v933_v24 }
  0x45   :  { %435 = vmatpush.bf16.msrb.mxu0 %v712_v55 }
  0x46   :  { %448 = vmatpush.bf16.msrb.mxu1 %v776_v56  ;;  %608 = vmatpush.bf16.msrb.mxu3 %v941_v23 }
  0x47   :  { %596 = vmatpush.bf16.msrb.mxu2 %v932_v40 }
  0x49   :  { %436 = vmatpush.bf16.msrb.mxu0 %v704_v1 }
  0x4a   :  { %449 = vmatpush.bf16.msrb.mxu1 %v768_v4  ;;  %609 = vmatpush.bf16.msrb.mxu3 %v940_v25 }
  0x4b   :  { %597 = vmatpush.bf16.msrb.mxu2 %v931_v42 }
  0x4d   :  { %437 = vmatpush.bf16.msrb.mxu0 %v696_v13 }
  0x4e   :  { %450 = vmatpush.bf16.msrb.mxu1 %v760_v16  ;;  %610 = vmatpush.bf16.msrb.mxu3 %v939_v27 }
  0x4f   :  { %598 = vmatpush.bf16.msrb.mxu2 %v930_v44 }
  0x52   :  { %611 = vmatpush.bf16.msrb.mxu3 %v938_v41 }
  0x53   :  { %599 = vmatpush.bf16.msrb.mxu2 %v929_v45 }
  0x56   :  { %612 = vmatpush.bf16.msrb.mxu3 %v937_v43 }
  0xad   :  { %v185_v30 = vpop.f32.mrf.mxu0 }
  0xae   :  { %v186_v31 = vadd.f32 %v185_v30, %v92_v28  ;;  %v198_v32 = vpop.f32.mrf.mxu1 }
  0xaf   :  { %v199_v33 = vadd.f32 %v198_v32, %v93_v29 }
  0xb0   :  { %v202_v34 = vmax.f32 %v186_v31, 0.0 }
  0xb1   :  { %v203_v35 = vmax.f32 %v199_v33, 0.0 }
  0xb2   :  { %v204_v36 = vpack.c.bf16 %v202_v34, %v202_v34 }
  0xb3   :  { %v205_v37 = vpack.c.bf16 %v203_v35, %v203_v35 }
  0xb4   :  { %412 = vmatmul.bf16.vlgmr.msra.gmra.mxu2 %v204_v36  ;;  %438 = vmatmul.bf16.vlgmr.msrb.gmra.mxu0 %v204_v36 }
  0xb5   :  { %425 = vmatmul.bf16.vlgmr.msra.gmra.mxu3 %v205_v37  ;;  %451 = vmatmul.bf16.vlgmr.msrb.gmra.mxu1 %v205_v37  ;;  %v187_v38 = vpop.f32.mrf.mxu0 }
  0xb6   :  { %v200_v39 = vpop.f32.mrf.mxu1 }
 0x131   :  { %v439_v48 = vpop.f32.mrf.mxu0 }
 0x132   :  { %v440_v49 = vadd.f32 %v439_v48, %v241_v47  ;;  %v452_v50 = vpop.f32.mrf.mxu1 }
 0x134   :  { %v453_v51 = vadd.f32 %v452_v50, %v440_v49 }
 0x136   :  { %v457_v53 = vmax.f32 %v453_v51, 0.0 }
 0x137   :  { %v413_v54 = vpop.f32.mrf.mxu2 }
 0x138   :  { %v459_v55 = vpack.c.bf16 %v457_v53, %v457_v53  ;;  %v414_v56 = vadd.f32 %v413_v54, %v240_v52  ;;  %v426_v57 = vpop.f32.mrf.mxu3 }
 0x139   :  { %v441_v58 = vpop.f32.mrf.mxu0 }
 0x13a   :  { %v427_v59 = vadd.f32 %v426_v57, %v414_v56  ;;  %v454_v60 = vpop.f32.mrf.mxu1  ;;  %613 = vmatmul.bf16.vlgmr.msrb.gmra.mxu3 %v459_v55 }
 0x13c   :  { %v456_v61 = vmax.f32 %v427_v59, 0.0 }
 0x13e   :  { %v458_v62 = vpack.c.bf16 %v456_v61, %v456_v61 }
 0x13f   :  { %v415_v63 = vpop.f32.mrf.mxu2 }
 0x140   :  { %v428_v0 = vpop.f32.mrf.mxu3  ;;  %600 = vmatmul.bf16.vlgmr.msrb.gmra.mxu2 %v458_v62 }
 0x1bd   :  { %v614_v1 = vpop.f32.mrf.mxu3 }
 0x1c3   :  { %v601_v3 = vpop.f32.mrf.mxu2 }
 0x1c4   :  { %v602_v4 = vadd.f32 %v952_v2, %v601_v3 }
 0x1c5   :  { %v616_v5 = vpop.f32.mrf.mxu3 }
 0x1c6   :  { %v615_v6 = vadd.f32 %v614_v1, %v602_v4 }
 0x1c8   :  { %618 = vst [vmem:[%s1107_s7] sm:$0xff] %v615_v6 }
 0x1cb   :  { %v603_v7 = vpop.f32.mrf.mxu2 }
 0x1cc   :  { %623 = vsyncpa [#allocation3], 1 }
 0x1cd   :  { %624 = vsyncpa [#allocation5], 1 }

</bundles_post_ra>
